<compile_context>
chip_gen: v5e
topology: v5e:2x2
jax: 0.10.0
libtpu: 0.0.40
codegen_flags: <defaults>
</compile_context>

<pallas_src>
import math
import numpy as np
import jax
import jax.numpy as jnp
from jax.experimental import pallas as pl
from jax.experimental.pallas import tpu as pltpu

_SQRT2_INV = 1.0 / math.sqrt(2.0)
# pywt 'haar' reconstruction filters (the reference DWT_2D uses rec_lo / rec_hi).
_HAAR_BAND_LOW = (_SQRT2_INV, _SQRT2_INV)
_HAAR_BAND_HIGH = (_SQRT2_INV, -_SQRT2_INV)


def _haar_dwt_matrices(h, w):
    """Build matrix_low_0 (H/2,H), matrix_low_1 (W,W/2), matrix_high_0 (H/2,H),
    matrix_high_1 (W,W/2) exactly as DWT_2D.get_matrix() does for 'haar'."""
    band_low = np.asarray(_HAAR_BAND_LOW, np.float64)
    band_high = np.asarray(_HAAR_BAND_HIGH, np.float64)
    band_length = band_low.shape[0]          # 2
    half = band_length // 2                  # 1
    l1 = max(h, w)
    l = l1 // 2
    matrix_h = np.zeros((l, l1 + band_length - 2), np.float64)
    matrix_g = np.zeros((l1 - l, l1 + band_length - 2), np.float64)
    idx = 0
    for i in range(l):
        matrix_h[i, idx:idx + band_length] = band_low
        idx += 2
    idx = 0
    for i in range(l1 - l):
        matrix_g[i, idx:idx + band_length] = band_high
        idx += 2
    end = None if half == 1 else (-half + 1)
    m_low_0 = matrix_h[: h // 2, : h + band_length - 2][:, half - 1:end]
    m_low_1 = matrix_h[: w // 2, : w + band_length - 2][:, half - 1:end].T
    m_high_0 = matrix_g[: h - h // 2, : h + band_length - 2][:, half - 1:end]
    m_high_1 = matrix_g[: w - w // 2, : w + band_length - 2][:, half - 1:end].T
    return (m_low_0.astype(np.float32), m_low_1.astype(np.float32),
            m_high_0.astype(np.float32), m_high_1.astype(np.float32))


def _haar_sum_weights(h, w):
    """sum(LL+LH+HL+HH) = 1ᵀ(ML0+MH0) x (ML1+MH1)1 = Σ u[h] v[w] x[h,w].
    Returns the (H*W, 1) float32 weight column in row-major (h*W + w) order,
    matching x.reshape(B*C, H*W)."""
    ml0, ml1, mh0, mh1 = _haar_dwt_matrices(h, w)
    u = (ml0 + mh0).sum(axis=0)            # (H,)  = 1ᵀ (ML0 + MH0)
    v = (ml1 + mh1).sum(axis=1)            # (W,)  = (ML1 + MH1) · 1
    return np.outer(u, v).reshape(h * w, 1).astype(np.float32)


def _downsample_sum_kernel(x_ref, w_ref, o_ref):
    # x_ref: (TILE_BC, H*W)   w_ref: (H*W, 1)   o_ref: (TILE_BC, 1)
    # One MXU matvec per block: load + dot, no XLU 2-D reduction.
    o_ref[...] = jnp.dot(x_ref[...], w_ref[...],
                         preferred_element_type=jnp.float32).astype(o_ref.dtype)


def _round_up(n, m):
    return ((n + m - 1) // m) * m


def _choose_tile_bc(bc, hw):
    """Rows of the flattened (B*C, H*W) array per grid step: target ~4 MiB blocks
    (double-buffered -> ~8 MiB VMEM), multiple of 8 sublanes."""
    bytes_per_row = hw * 4
    tile = max(8, (4 * 1024 * 1024) // max(bytes_per_row, 1))
    tile = max(8, (tile // 8) * 8)
    tile = min(tile, 1024)
    bc_pad = _round_up(bc, 8)
    tile = min(tile, bc_pad)
    # Keep >= 2 grid steps when there is enough work so v7x's two TensorCores
    # (and megacore sharding generally) both get a share of the parallel axis.
    if tile >= bc_pad and bc_pad >= 16:
        tile = max(8, _round_up(bc_pad // 2, 8))
    return tile


def downsample_sum(x):
    """Pallas implementation of DownsampleSum.forward. x: (B, C, H, W) -> (B, C)."""
    b, c, h, w = x.shape
    bc, hw = b * c, h * w
    wgt = jnp.asarray(_haar_sum_weights(h, w))           # (H*W, 1), tiny
    x2 = x.reshape(bc, hw).astype(jnp.float32)

    tile_bc = _choose_tile_bc(bc, hw)
    bc_pad = _round_up(bc, tile_bc)
    if bc_pad != bc:
        # Zero rows contribute 0 to the weighted sum; sliced off afterwards.
        x2 = jnp.pad(x2, ((0, bc_pad - bc), (0, 0)))

    out = pl.pallas_call(
        _downsample_sum_kernel,
        out_shape=jax.ShapeDtypeStruct((bc_pad, 1), jnp.float32),
        grid=(bc_pad // tile_bc,),
        in_specs=[
            pl.BlockSpec((tile_bc, hw), lambda i: (i, 0)),   # batched image rows
            pl.BlockSpec((hw, 1), lambda i: (0, 0)),         # constant weight column
        ],
        out_specs=pl.BlockSpec((tile_bc, 1), lambda i: (i, 0)),
        compiler_params=pltpu.CompilerParams(
            dimension_semantics=("parallel",)),
    )(x2, wgt)
    return out[:bc, 0].reshape(b, c)


def downsample_sum_ref(x):
    """Pure-JAX reference mirroring the PyTorch DWT_2D + sum semantics exactly
    (six dense matmuls, then spatial sum)."""
    ml0, ml1, mh0, mh1 = (jnp.asarray(m) for m in _haar_dwt_matrices(x.shape[2], x.shape[3]))
    lo = jnp.einsum('ih,bchw->bciw', ml0, x)
    hi = jnp.einsum('ih,bchw->bciw', mh0, x)
    ll = jnp.einsum('bciw,wj->bcij', lo, ml1)
    lh = jnp.einsum('bciw,wj->bcij', lo, mh1)
    hl = jnp.einsum('bciw,wj->bcij', hi, ml1)
    hh = jnp.einsum('bciw,wj->bcij', hi, mh1)
    return jnp.sum(ll + lh + hl + hh, axis=(2, 3))


if __name__ == "__main__":
    key = jax.random.PRNGKey(0)
    x = jax.random.normal(key, (2, 4, 16, 16), dtype=jnp.float32)

    out = jax.block_until_ready(downsample_sum(x))
    ref = jax.block_until_ready(downsample_sum_ref(x))

    np.testing.assert_allclose(np.asarray(out), np.asarray(ref),
                               rtol=1e-5, atol=1e-4)
    assert out.shape == (2, 4) and out.dtype == jnp.float32
    print("KERNEL_OK")
</pallas_src>

<mosaic_0001>
module attributes {stable_mosaic.version = 11 : i64} {
  func.func @_downsample_sum_kernel(%arg0: i32, %arg1: memref<8x256xf32, #tpu.memory_space<vmem>>, %arg2: memref<256x1xf32, #tpu.memory_space<vmem>>, %arg3: memref<8x1xf32, #tpu.memory_space<vmem>>) attributes {dimension_semantics = [#tpu.dimension_semantics<parallel>], iteration_bounds = array<i64: 1>, scalar_prefetch = 0 : i64, scratch_operands = 0 : i64, tpu.core_type = #tpu.core_type<tc>, window_params = [{transform_indices = @transform_0, window_bounds = array<i64: 8, 256>}, {pipeline_mode = #tpu.pipeline_mode<synchronous>, transform_indices = @transform_1, window_bounds = array<i64: 256, 1>}, {transform_indices = @transform_2, window_bounds = array<i64: 8, 1>}]} {
    %c0 = arith.constant 0 : index
    %c0_0 = arith.constant 0 : index
    %0 = vector.load %arg1[%c0, %c0_0] : memref<8x256xf32, #tpu.memory_space<vmem>>, vector<8x256xf32>
    %c0_1 = arith.constant 0 : index
    %c0_2 = arith.constant 0 : index
    %1 = vector.load %arg2[%c0_1, %c0_2] : memref<256x1xf32, #tpu.memory_space<vmem>>, vector<256x1xf32>
    %cst = arith.constant dense<0.000000e+00> : vector<8x1xf32>
    %2 = tpu.matmul %0, %1, %cst {dimension_numbers = #tpu.dot_dimension_numbers<[1], [0], [0], [1], [0, 0, 1, 1], [], []>} : vector<8x256xf32>, vector<256x1xf32>, vector<8x1xf32> -> vector<8x1xf32>
    %c0_3 = arith.constant 0 : index
    %c0_4 = arith.constant 0 : index
    %3 = vector.load %arg3[%c0_3, %c0_4] : memref<8x1xf32, #tpu.memory_space<vmem>>, vector<8x1xf32>
    tpu.vector_store %arg3[%c0_3, %c0_4], %2 {strides = array<i32>} : memref<8x1xf32, #tpu.memory_space<vmem>>, vector<8x1xf32>,
    return
  }
  func.func @transform_0(%arg0: i32) -> (i32, i32) {
    %c0_i32 = arith.constant 0 : i32
    %c0_i32_0 = arith.constant 0 : i32
    return %arg0, %c0_i32 : i32, i32
  }
  func.func @transform_1(%arg0: i32) -> (i32, i32) {
    %c0_i32 = arith.constant 0 : i32
    %c0_i32_0 = arith.constant 0 : i32
    %c0_i32_1 = arith.constant 0 : i32
    return %c0_i32, %c0_i32_0 : i32, i32
  }
  func.func @transform_2(%arg0: i32) -> (i32, i32) {
    %c0_i32 = arith.constant 0 : i32
    %c0_i32_0 = arith.constant 0 : i32
    return %arg0, %c0_i32 : i32, i32
  }
}

</mosaic_0001>

<bundles_post_ra>
// kernel: tpu_custom_call.1
= control target key start
LH: loop header
LB: loop body
LE: loop exit
PB: predicated region body
PF: predicated region fallthrough
CT: control target
= control target key end

     0   :  { %vm85_vm0 = vcmask 7168   ;;  %s211_s1 = inlined_call_operand.vmem [shape: f32[256,1], index: 1, kind: input, shape index: {}]   ;;  %s212_s0 = inlined_call_operand.vmem [shape: f32[8,256], index: 0, kind: input, shape index: {}]   ;;  %s213_s2 = inlined_call_operand.vmem [shape: f32[8,1], index: 2, kind: output, shape index: {}]  }
   0x1   :  { %v28_v0 = vld [vmem:[%s211_s1 + $0x78] sm:$0xff]  ;;  %v27_v2 = vld [vmem:[%s211_s1 + $0x70] sm:$0xff]  ;;  %v26_v4 = vld [vmem:[%s211_s1 + $0x68] sm:$0xff] }
   0x2   :  { %v44_v1 = vld [vmem:[%s211_s1 + $0xf8] sm:$0xff]  ;;  %45 = vmatpush.msra.mxu0 %v28_v0  ;;  %v43_v3 = vld [vmem:[%s211_s1 + $0xf0] sm:$0xff]  ;;  %v42_v5 = vld [vmem:[%s211_s1 + $0xe8] sm:$0xff] }
   0x3   :  { %65 = vmatpush.msra.mxu1 %v44_v1  ;;  %v25_v6 = vld [vmem:[%s211_s1 + $0x60] sm:$0xff]  ;;  %v24_v8 = vld [vmem:[%s211_s1 + $0x58] sm:$0xff]  ;;  %v23_v10 = vld [vmem:[%s211_s1 + $0x50] sm:$0xff] }
   0x4   :  { %46 = vmatpush.msra.mxu0 %v27_v2  ;;  %v41_v7 = vld [vmem:[%s211_s1 + $0xe0] sm:$0xff]  ;;  %v40_v9 = vld [vmem:[%s211_s1 + $0xd8] sm:$0xff]  ;;  %v39_v11 = vld [vmem:[%s211_s1 + $0xd0] sm:$0xff] }
   0x5   :  { %66 = vmatpush.msra.mxu1 %v43_v3  ;;  %v22_v12 = vld [vmem:[%s211_s1 + $0x48] sm:$0xff]  ;;  %v21_v14 = vld [vmem:[%s211_s1 + $0x40] sm:$0xff]  ;;  %v20_v16 = vld [vmem:[%s211_s1 + $0x38] sm:$0xff] }
   0x6   :  { %47 = vmatpush.msra.mxu0 %v26_v4  ;;  %v38_v13 = vld [vmem:[%s211_s1 + $0xc8] sm:$0xff]  ;;  %v37_v15 = vld [vmem:[%s211_s1 + $0xc0] sm:$0xff]  ;;  %v36_v17 = vld [vmem:[%s211_s1 + $0xb8] sm:$0xff] }
   0x7   :  { %67 = vmatpush.msra.mxu1 %v42_v5  ;;  %v19_v18 = vld [vmem:[%s211_s1 + $0x30] sm:$0xff]  ;;  %v18_v20 = vld [vmem:[%s211_s1 + $0x28] sm:$0xff]  ;;  %v17_v22 = vld [vmem:[%s211_s1 + $0x20] sm:$0xff] }
   0x8   :  { %48 = vmatpush.msra.mxu0 %v25_v6  ;;  %v35_v19 = vld [vmem:[%s211_s1 + $0xb0] sm:$0xff]  ;;  %v34_v21 = vld [vmem:[%s211_s1 + $0xa8] sm:$0xff]  ;;  %v33_v23 = vld [vmem:[%s211_s1 + $0xa0] sm:$0xff] }
   0x9   :  { %68 = vmatpush.msra.mxu1 %v41_v7  ;;  %v16_v24 = vld [vmem:[%s211_s1 + $0x18] sm:$0xff]  ;;  %v15_v26 = vld [vmem:[%s211_s1 + $0x10] sm:$0xff]  ;;  %v14_v28 = vld [vmem:[%s211_s1 + $0x8] sm:$0xff] }
   0xa   :  { %49 = vmatpush.msra.mxu0 %v24_v8  ;;  %v32_v25 = vld [vmem:[%s211_s1 + $0x98] sm:$0xff]  ;;  %v31_v27 = vld [vmem:[%s211_s1 + $0x90] sm:$0xff]  ;;  %v30_v29 = vld [vmem:[%s211_s1 + $0x88] sm:$0xff] }
   0xb   :  { %69 = vmatpush.msra.mxu1 %v40_v9  ;;  %v13_v30 = vld [vmem:[%s211_s1] sm:$0xff]  ;;  %v12_v33 = vld [vmem:[%s212_s0 + $0x8] sm:$0xff] }
   0xc   :  { %50 = vmatpush.msra.mxu0 %v23_v10  ;;  %v29_v31 = vld [vmem:[%s211_s1 + $0x80] sm:$0xff] }
   0xd   :  { %70 = vmatpush.msra.mxu1 %v39_v11  ;;  %v11_v32 = vld [vmem:[%s212_s0] sm:$0xff] }
   0xe   :  { %51 = vmatpush.msra.mxu0 %v22_v12 }
   0xf   :  { %71 = vmatpush.msra.mxu1 %v38_v13 }
  0x10   :  { %52 = vmatpush.msra.mxu0 %v21_v14 }
  0x11   :  { %72 = vmatpush.msra.mxu1 %v37_v15 }
  0x12   :  { %53 = vmatpush.msra.mxu0 %v20_v16 }
  0x13   :  { %73 = vmatpush.msra.mxu1 %v36_v17 }
  0x14   :  { %54 = vmatpush.msra.mxu0 %v19_v18 }
  0x15   :  { %74 = vmatpush.msra.mxu1 %v35_v19 }
  0x16   :  { %55 = vmatpush.msra.mxu0 %v18_v20 }
  0x17   :  { %75 = vmatpush.msra.mxu1 %v34_v21 }
  0x18   :  { %56 = vmatpush.msra.mxu0 %v17_v22 }
  0x19   :  { %76 = vmatpush.msra.mxu1 %v33_v23 }
  0x1a   :  { %57 = vmatpush.msra.mxu0 %v16_v24 }
  0x1b   :  { %77 = vmatpush.msra.mxu1 %v32_v25 }
  0x1c   :  { %58 = vmatpush.msra.mxu0 %v15_v26 }
  0x1d   :  { %78 = vmatpush.msra.mxu1 %v31_v27 }
  0x1e   :  { %59 = vmatpush.msra.mxu0 %v14_v28 }
  0x1f   :  { %79 = vmatpush.msra.mxu1 %v30_v29 }
  0x20   :  { %60 = vmatpush.msra.mxu0 %v13_v30 }
  0x21   :  { %80 = vmatpush.msra.mxu1 %v29_v31  ;;  %61 = vmatmul.f32.vlgmr.msra.gmra.mxu0 %v11_v32 }
  0x22   :  { %81 = vmatmul.f32.vlgmr.msra.gmra.mxu1 %v12_v33 }
  0x9e   :  { %v62_v34 = vpop.f32.mrf.mxu0 }
  0x9f   :  { %v82_v35 = vpop.f32.mrf.mxu1 }
  0xa0   :  { %v83_v36 = vadd.f32 %v82_v35, %v62_v34 }
  0xa2   :  { %86 = vst.msk [vmem:[%s213_s2] sm:$0xff] %vm85_vm0, %v83_v36 }

</bundles_post_ra>
